<compile_context>
chip_gen: v5e
topology: v5e:2x2
jax: 0.10.0
libtpu: 0.0.40
codegen_flags: <defaults>
</compile_context>

<pallas_src>
import functools
import math

import jax
import jax.numpy as jnp
from jax.experimental import pallas as pl
from jax.experimental.pallas import tpu as pltpu


def _downsample_kernel(x_ref, o_ref, *, split_store: bool):
    """2x2 space-to-depth for one (batch, row-pair tile, col-pair tile) block.

    x_ref block: (1, TH, 2, TW, 2c)
        dim 2 selects even (0) / odd (1) spatial row of each row pair,
        last dim already packs [even-col | odd-col] channels contiguously.
    o_ref block: (1, TH, TW, 4c) with channel order [TL | TR | BL | BR].
    """
    c2 = x_ref.shape[-1]
    top = x_ref[0, :, 0, :, :]   # rows 2*q   -> [TL | TR], (TH, TW, 2c)
    bot = x_ref[0, :, 1, :, :]   # rows 2*q+1 -> [BL | BR], (TH, TW, 2c)
    if split_store:
        # 2c is a multiple of 128 lanes: two direct, unmasked slice stores.
        # Streams input-VMEM -> vreg -> output-VMEM exactly once.
        o_ref[0, :, :, :c2] = top
        o_ref[0, :, :, c2:] = bot
    else:
        # 2c not lane-aligned (but 4c >= 128): a 2c-wide store would be a
        # masked partial store; write the full 4c row in one go instead.
        o_ref[0] = jnp.concatenate([top, bot], axis=-1)


def _pick_tiles(b: int, hp: int, wp: int, c4: int, itemsize: int,
                target_bytes: int) -> tuple[int, int]:
    """Pick (row-pair tile, col-pair tile) so one block is ~target_bytes.

    Input and output blocks are the same size, and each is double-buffered by
    the Pallas pipeline, so VMEM in flight is ~4x the returned block size.
    """
    col_bytes = c4 * itemsize                       # one (row-pair, col-pair) cell
    target = max(int(target_bytes), col_bytes)

    # Column-pair tile: full width when a single row-pair slab fits the
    # budget, otherwise a multiple-of-8 tile (sublane constraint on the
    # second-to-last block dim when it is not the full extent).
    if wp * col_bytes <= target:
        tw = wp
    else:
        tw = max(8, min(wp, (target // col_bytes) // 8 * 8))
        n_col = pl.cdiv(wp, tw)
        tw = min(wp, ((pl.cdiv(wp, n_col) + 7) // 8) * 8)  # balance col tiles

    # Row-pair tile: as many slabs as fit the per-block budget.
    slab_bytes = tw * col_bytes
    th = max(1, min(hp, target // slab_bytes))
    if b == 1 and tw == wp and hp >= 2:
        # Guarantee >= 2 tiles on the parallel axes so both v7x TensorCores
        # (each with its own ~3.2 TB/s HBM path) get work; no-op on v5e/v6e.
        th = min(th, pl.cdiv(hp, 2))
    th = pl.cdiv(hp, pl.cdiv(hp, th))               # balance row tiles
    return th, tw


def _downsample_jax(v: jax.Array, b: int, hp: int, wp: int, c4: int) -> jax.Array:
    """Plain-XLA fallback for lane-sparse channel counts (4c < 128)."""
    # v: (b, hp, 2, wp, 2c) -> (b, hp, wp, 2, 2c) -> (b, hp*wp, 4c)
    v = jnp.transpose(v, (0, 1, 3, 2, 4))
    return v.reshape(b, hp * wp, c4)


def downsample_block(x: jax.Array, *,
                     tile_target_bytes: int = 6 * 1024 * 1024,
                     vmem_limit_bytes: int = 48 * 1024 * 1024) -> jax.Array:
    """JAX/Pallas equivalent of DownSampleBlock.forward.

    Args:
        x: (b, seq_len, c); seq_len must be a perfect square.
        tile_target_bytes: per-block footprint target.  VMEM in flight is
            ~4x this (input + output blocks, each double-buffered); it is
            clamped to vmem_limit_bytes // 5 to keep headroom.
        vmem_limit_bytes: scoped-VMEM limit passed to Mosaic (48 MiB is safe
            on v5e/v6e (128 MiB physical) and v7x (64 MiB physical)).

    Returns:
        (b, ceil(h/2) * ceil(w/2), 4c) with h = w = isqrt(seq_len).
    """
    b, seq_len, c = x.shape
    h = w = math.isqrt(seq_len)
    if h * h != seq_len:
        raise ValueError(f"seq_len={seq_len} must be a perfect square")
    v = x.reshape(b, h, w, c)

    # Zero-pad odd spatial dims (mirrors the torch zero-concat) as one fused
    # pad.  Real ViT grids are even so this path is normally dead.
    pad_h, pad_w = h % 2, w % 2
    if pad_h or pad_w:
        v = jnp.pad(v, ((0, 0), (0, pad_h), (0, pad_w), (0, 0)))
        h += pad_h
        w += pad_w

    hp, wp = h // 2, w // 2
    c2, c4 = 2 * c, 4 * c
    itemsize = jnp.dtype(x.dtype).itemsize

    # Free (metadata-only) row-major view: group row pairs and column pairs.
    # (b, h, w, c) -> (b, h//2, 2, w//2, 2c)
    v = v.reshape(b, hp, 2, wp, c2)

    if c4 < 128:
        # Lane-sparse output (test-only configs): masked vst.msk stores waste
        # lane + DMA bandwidth, so just let XLA do the copy.
        return _downsample_jax(v, b, hp, wp, c4)

    target = min(int(tile_target_bytes), vmem_limit_bytes // 5)
    th, tw = _pick_tiles(b, hp, wp, c4, itemsize, target)
    grid = (b, pl.cdiv(hp, th), pl.cdiv(wp, tw))
    split_store = (c2 % 128 == 0)

    out4 = pl.pallas_call(
        functools.partial(_downsample_kernel, split_store=split_store),
        out_shape=jax.ShapeDtypeStruct((b, hp, wp, c4), x.dtype),
        grid=grid,
        in_specs=[
            pl.BlockSpec((1, th, 2, tw, c2), lambda i, t, u: (i, t, 0, u, 0)),
        ],
        out_specs=pl.BlockSpec((1, th, tw, c4), lambda i, t, u: (i, t, u, 0)),
        compiler_params=pltpu.CompilerParams(
            dimension_semantics=("parallel", "parallel", "parallel"),
            vmem_limit_bytes=vmem_limit_bytes),
        cost_estimate=pl.CostEstimate(
            flops=0,
            transcendentals=0,
            bytes_accessed=2 * b * h * w * c * itemsize),
    )(v)

    # Contiguous, metadata-only reshape to the module's (b, seq/4, 4c) output.
    return out4.reshape(b, hp * wp, c4)


def _reference(x: jax.Array) -> jax.Array:
    """Pure-JAX transcription of the torch forward (for verification)."""
    b, s, c = x.shape
    h = w = math.isqrt(s)
    v = x.reshape(b, h, w, c)
    if h % 2 == 1:
        v = jnp.concatenate([v, jnp.zeros((b, 1, w, c), v.dtype)], axis=1)
        h += 1
    if w % 2 == 1:
        v = jnp.concatenate([v, jnp.zeros((b, h, 1, c), v.dtype)], axis=2)
        w += 1
    v = v.reshape(b, h, w // 2, 2 * c)
    v = jnp.transpose(v, (0, 2, 1, 3))
    v = v.reshape(b, h // 2, w // 2, 4 * c)
    v = jnp.transpose(v, (0, 2, 1, 3))
    return v.reshape(b, -1, 4 * c)


if __name__ == "__main__":
    key = jax.random.PRNGKey(0)
    k1, k2, k3, k4, k5, k6 = jax.random.split(key, 6)

    # 1) Production-like layout: 2c = 128 -> lane-aligned two-slice-store path.
    x1 = jax.random.normal(k1, (2, 64, 64), dtype=jnp.float32)
    y1 = jax.block_until_ready(downsample_block(x1))
    assert y1.shape == (2, 16, 256), y1.shape
    assert y1.dtype == x1.dtype
    assert jnp.array_equal(y1, _reference(x1)), "mismatch (test 1)"

    # 2) 2c = 64, 4c = 128 -> single full-width-store (concat) path.
    x2 = jax.random.normal(k2, (2, 16, 32), dtype=jnp.float32)
    y2 = jax.block_until_ready(downsample_block(x2))
    assert y2.shape == (2, 4, 128), y2.shape
    assert jnp.array_equal(y2, _reference(x2)), "mismatch (test 2)"

    # 3) Odd spatial size (h = w = 5) -> zero-padding path + concat store.
    x3 = jax.random.normal(k3, (2, 25, 32), dtype=jnp.float32)
    y3 = jax.block_until_ready(downsample_block(x3))
    assert y3.shape == (2, 9, 128), y3.shape
    assert jnp.array_equal(y3, _reference(x3)), "mismatch (test 3)"

    # 4) Lane-sparse channels (4c = 64 < 128) -> plain-XLA fallback path.
    x4 = jax.random.normal(k4, (2, 16, 16), dtype=jnp.float32)
    y4 = jax.block_until_ready(downsample_block(x4))
    assert y4.shape == (2, 4, 64), y4.shape
    assert jnp.array_equal(y4, _reference(x4)), "mismatch (test 4)"

    # 5) Non-divisor row-pair tiling (cdiv grid, partial edge block) with b=1.
    x5 = jax.random.normal(k5, (1, 4096, 64), dtype=jnp.float32)
    y5 = jax.block_until_ready(
        downsample_block(x5, tile_target_bytes=96 * 1024))
    assert y5.shape == (1, 1024, 256), y5.shape
    assert jnp.array_equal(y5, _reference(x5)), "mismatch (test 5)"

    # 6) Column-pair (wp) tiling path: row slab exceeds the block budget.
    x6 = jax.random.normal(k6, (1, 1024, 64), dtype=jnp.float32)
    y6 = jax.block_until_ready(
        downsample_block(x6, tile_target_bytes=8 * 1024))
    assert y6.shape == (1, 256, 256), y6.shape
    assert jnp.array_equal(y6, _reference(x6)), "mismatch (test 6)"

    print("KERNEL_OK")
</pallas_src>

<mosaic_0001>
module attributes {stable_mosaic.version = 11 : i64} {
  func.func @_downsample_kernel(%arg0: i32, %arg1: i32, %arg2: i32, %arg3: memref<1x4x2x4x128xf32, #tpu.memory_space<vmem>>, %arg4: memref<1x4x4x256xf32, #tpu.memory_space<vmem>>) attributes {dimension_semantics = [#tpu.dimension_semantics<parallel>, #tpu.dimension_semantics<parallel>, #tpu.dimension_semantics<parallel>], iteration_bounds = array<i64: 2, 1, 1>, scalar_prefetch = 0 : i64, scratch_operands = 0 : i64, tpu.core_type = #tpu.core_type<tc>, window_params = [{transform_indices = @transform_0, window_bounds = array<i64: 1, 4, 2, 4, 128>}, {transform_indices = @transform_1, window_bounds = array<i64: 1, 4, 4, 256>}]} {
    %c0 = arith.constant 0 : index
    %c0_0 = arith.constant 0 : index
    %c0_1 = arith.constant 0 : index
    %c0_2 = arith.constant 0 : index
    %c0_3 = arith.constant 0 : index
    %0 = vector.load %arg3[%c0, %c0_0, %c0_1, %c0_2, %c0_3] : memref<1x4x2x4x128xf32, #tpu.memory_space<vmem>>, vector<1x4x1x4x128xf32>
    %1 = vector.shape_cast %0 : vector<1x4x1x4x128xf32> to vector<4x4x128xf32>
    %c0_4 = arith.constant 0 : index
    %c0_5 = arith.constant 0 : index
    %c1 = arith.constant 1 : index
    %c0_6 = arith.constant 0 : index
    %c0_7 = arith.constant 0 : index
    %2 = vector.load %arg3[%c0_4, %c0_5, %c1, %c0_6, %c0_7] : memref<1x4x2x4x128xf32, #tpu.memory_space<vmem>>, vector<1x4x1x4x128xf32>
    %3 = vector.shape_cast %2 : vector<1x4x1x4x128xf32> to vector<4x4x128xf32>
    %c0_8 = arith.constant 0 : index
    %c0_9 = arith.constant 0 : index
    %c0_10 = arith.constant 0 : index
    %c0_11 = arith.constant 0 : index
    %4 = vector.load %arg4[%c0_8, %c0_9, %c0_10, %c0_11] : memref<1x4x4x256xf32, #tpu.memory_space<vmem>>, vector<1x4x4x128xf32>
    %5 = vector.shape_cast %4 : vector<1x4x4x128xf32> to vector<4x4x128xf32>
    %6 = vector.shape_cast %1 : vector<4x4x128xf32> to vector<1x4x4x128xf32>
    tpu.vector_store %arg4[%c0_8, %c0_9, %c0_10, %c0_11], %6 {strides = array<i32>} : memref<1x4x4x256xf32, #tpu.memory_space<vmem>>, vector<1x4x4x128xf32>,
    %c0_12 = arith.constant 0 : index
    %c0_13 = arith.constant 0 : index
    %c0_14 = arith.constant 0 : index
    %c128 = arith.constant 128 : index
    %7 = vector.load %arg4[%c0_12, %c0_13, %c0_14, %c128] : memref<1x4x4x256xf32, #tpu.memory_space<vmem>>, vector<1x4x4x128xf32>
    %8 = vector.shape_cast %7 : vector<1x4x4x128xf32> to vector<4x4x128xf32>
    %9 = vector.shape_cast %3 : vector<4x4x128xf32> to vector<1x4x4x128xf32>
    tpu.vector_store %arg4[%c0_12, %c0_13, %c0_14, %c128], %9 {strides = array<i32>} : memref<1x4x4x256xf32, #tpu.memory_space<vmem>>, vector<1x4x4x128xf32>,
    return
  }
  func.func @transform_0(%arg0: i32, %arg1: i32, %arg2: i32) -> (i32, i32, i32, i32, i32) {
    %c0_i32 = arith.constant 0 : i32
    %c0_i32_0 = arith.constant 0 : i32
    %c0_i32_1 = arith.constant 0 : i32
    return %arg0, %arg1, %c0_i32, %arg2, %c0_i32_0 : i32, i32, i32, i32, i32
  }
  func.func @transform_1(%arg0: i32, %arg1: i32, %arg2: i32) -> (i32, i32, i32, i32) {
    %c0_i32 = arith.constant 0 : i32
    %c0_i32_0 = arith.constant 0 : i32
    return %arg0, %arg1, %arg2, %c0_i32 : i32, i32, i32, i32
  }
}

</mosaic_0001>

<bundles_post_ra>
// kernel: tpu_custom_call.1
= control target key start
LH: loop header
LB: loop body
LE: loop exit
PB: predicated region body
PF: predicated region fallthrough
CT: control target
= control target key end

     0   :  { %6 = vsyncpa [#allocation3], 0  ;;  %s636_s0 = inlined_call_operand.hbm [shape: f32[2,4,2,4,128], index: 0, kind: input, shape index: {}]   ;;  %s637_s1 = inlined_call_operand.hbm [shape: f32[2,4,4,256], index: 1, kind: output, shape index: {}]  }
   0x1   :  { %8 = vsyncpa [#allocation3 + $0x1], 0 }
   0x2   :  { %9 = vsyncpa [#allocation4], 0 }
   0x3   :  { %11 = vsyncpa [#allocation4 + $0x1], 0  ;;  %s516_s6 = smov 0   ;;  %s518_s7 = smov 0  }
   0x4   :  { %s520_s8 = smov 0   ;;  %s522_s9 = smov 0  }
   0x5   :  { %s524_s10 = smov 0   ;;  %s526_s11 = smov 0  }
   0x6 LB: > { %s301_s12 = sadd.s32 4294967295, %s500_s11   ;;  %s302_s13 = sadd.s32 4294967294, %s500_s11   ;;  %s500_s11 = sphi %s526_s11, %s17_s11   ;;  %s496_s10 = sphi %s524_s10, %s646_s10   ;;  %s492_s9 = sphi %s522_s9, %s645_s9   ;;  %s488_s8 = sphi %s520_s8, %s644_s8   ;;  %s484_s7 = sphi %s518_s7, %s643_s7   ;;  %s480_s6 = sphi %s516_s6, %s642_s6  }
   0x7   : > { %s36_s14 = sadd.s32 1, %s496_s10  ;;  %s47_s15 = sadd.s32 1, %s488_s8 }
   0x8   : > { %p38_p0 = scmp.ge.s32.totalorder %s36_s14, 2  ;;  %p54_p1 = scmp.ne.s32.totalorder %s488_s8, %s484_s7 }
   0x9   : > { %p55_p2 = scmp.eq.s32.totalorder %s500_s11, 0  ;;  %p60_p3 = scmp.ne.s32.totalorder %s484_s7, %s480_s6 }
   0xa   : > { %s648_s14 = smov (%p38_p0, %s36_s14), 0  ;;  %p61_p5 = scmp.eq.s32.totalorder %s301_s12, 0 }
   0xb   : > { %p557_p4 = por %p55_p2, %p54_p1  ;;  %s40_s17 = ssub.s32 %s496_s10, %s648_s14 }
   0xc   : > { %p88_p6 = scmp.eq.s32.totalorder %s301_s12, 1  ;;  %p45_p7 = scmp.eq.s32.totalorder %s40_s17, 0 }
   0xd   : > { %p563_p8 = por %p61_p5, %p60_p3  ;;  %p94_p10 = scmp.eq.s32.totalorder %s302_s13, 1 }
   0xe   : > { %p567_p9 = por %p88_p6, %p54_p1  ;;  %p304_p12 = scmp.ge.s32.totalorder %s500_s11, 2 }
   0xf   : > { %s572_s20 = scalar_select %p45_p7, %s488_s8, %s47_s15  }
  0x10   : > { %p574_p11 = por %p94_p10, %p60_p3  ;;  %p334_p13 = scmp.lt.s32.totalorder %s500_s11, 2 }
  0x11   : > { %s114_s22 = sand.u32 1, %s488_s8   ;;  %s320_s24 = sshll.u32 %s496_s10, 5 }
  0x12   : > { %s305_s23 = sshll.u32 %s114_s22, 5  ;;  %s127_s27 = scalar_lea.hbm %s636_s0, %s320_s24 }
  0x13   : > { %s118_s28 = scalar_lea.vmem [#allocation2], %s305_s23  ;;  %s128_s30 = sshll.u32 %s127_s27, 4  ;;  %s129_s30 = int_to_ptr.hbm [resolvable:$true] %s128_s30 }
  0x14   : > { %s130_s29 = sshll.u32 %s118_s28, 4  ;;  %p327_p0 = pnand %p334_p13, %p557_p4  ;;  %s131_s29 = int_to_ptr.vmem [resolvable:$true] %s130_s29 }
  0x15   : > { %p308_p1 = scmp.ge.s32.totalorder %s500_s11, 1  ;;  %s115_s2 = scalar_lea.sflag [#allocation3], %s114_s22 }
  0x16   : > { %s502_s3 = smov 64   ;;  %s503_s4 = smov 4  }
  0x17   : > { %329 = dma.hbm_to_vmem [thread:$0]  (!%p327_p0), %s129_s30, 512, %s131_s29, %s115_s2, %s502_s3, %s502_s3, %s503_s4  }
  0x18   : > { %p138_p2 = scmp.lt.s32.totalorder %s500_s11, 3 }
  0x1a   : > { %p139_p3 = pnand %p308_p1, %p138_p2 }
  0x1b   : > { %s590_s5 = sand.u32 (!%p139_p3), 1, %s484_s7  }
  0x1c   : > { %142 = sbr.rel (%p139_p3) target bundleno = 50 (0x32), region = 24  ;;  %s309_s12 = sshll.u32 (!%p139_p3), %s590_s5, 5 }
  0x1d   : > { %s145_s13 = scalar_lea.sflag (!%p139_p3), [#allocation3], %s590_s5  ;;  %s148_s15 = scalar_lea.vmem (!%p139_p3), [#allocation2], %s309_s12 }
  0x21   : > { %471 = dma.done.wait (%p563_p8), %s145_s13, 512  }
  0x22   : > { %473 = vsyncadd (%p563_p8), %s145_s13, 4294966784  ;;  %s321_s16 = sshll.u32 %s492_s9, 5  ;;  %s167_s24 = scalar_lea.vmem [#allocation5], %s309_s12  ;;  %v170_v0 = vld [vmem:[%s148_s15] sm:$0xff]   ;;  %v171_v1 = vld [vmem:[%s148_s15 + $0x8] sm:$0xff]  }
  0x23   : > { %s204_s23 = scalar_lea.hbm %s637_s1, %s321_s16  ;;  %s205_s25 = sshll.u32 %s167_s24, 4  ;;  %v172_v2 = vld [vmem:[%s148_s15 + $0x10] sm:$0xff]   ;;  %179 = vst [vmem:[%s167_s24] sm:$0xff] %v170_v0   ;;  %v173_v3 = vld [vmem:[%s148_s15 + $0x18] sm:$0xff]   ;;  %s206_s25 = int_to_ptr.vmem [resolvable:$true] %s205_s25 }
  0x24   : > { %s207_s26 = sshll.u32 %s204_s23, 4  ;;  %180 = vst [vmem:[%s167_s24 + $0x8] sm:$0xff] %v171_v1   ;;  %s188_s18 = scalar_lea.sflag [#allocation4], %s590_s5  ;;  %s208_s26 = int_to_ptr.hbm [resolvable:$true] %s207_s26 }
  0x25   : > { %181 = vst [vmem:[%s167_s24 + $0x10] sm:$0xff] %v172_v2   ;;  %s432_s9 = sshra.s32 %s208_s26, 4  ;;  %s438_s30 = scalar_lea.hbm %s637_s1, 64  ;;  %s433_s9 = int_to_ptr.hbm [resolvable:$true] %s432_s9 }
  0x26   : > { %182 = vst [vmem:[%s167_s24 + $0x18] sm:$0xff] %v173_v3   ;;  %s434_s27 = scalar_lea.hbm %s433_s9, 32  ;;  %p439_p7 = scmp.lt.s32.totalorder %s433_s9, %s637_s1 }
  0x27   : > { %p435_p4 = scmp.ne.s32.totalorder %s433_s9, %s434_s27  ;;  %p440_p8 = scmp.lt.s32.totalorder %s438_s30, %s434_s27 }
  0x29   : > { %p436_p5 = pnand %p435_p4, %p567_p9  ;;  %p441_p10 = por %p440_p8, %p439_p7 }
  0x2b   : > { %p437_p6 = pneg %p436_p5 }
  0x2d   : > { %p442_p13 = pnand %p441_p10, %p437_p6 }
  0x2f   : > { %445 = shalt.err (!%p442_p13)
}
  0x30   : > { %s504_s4 = smov 128   ;;  %s505_s5 = smov 8  }
  0x31   : > { %324 = dma.vmem_to_hbm [thread:$0]  (%p567_p9), %s206_s25, 512, %s208_s26, %s188_s18, %s504_s4, %s504_s4, %s505_s5  }
  0x32 PF: > { %s222_s12 = sand.u32 1, %s480_s6   ;;  %p331_p0 = pnand %p304_p12, %p574_p11 }
  0x33   : > { %s223_s13 = scalar_lea.sflag [#allocation4], %s222_s12 }
  0x34   : > { %p332_p1 = pneg %p331_p0 }
  0x36   : > { %475 = dma.done.wait (%p332_p1), %s223_s13, 512  }
  0x37   : > { %477 = vsyncadd (%p332_p1), %s223_s13, 4294966784  ;;  %s17_s11 = sadd.s32 1, %s500_s11   ;;  %s642_s6 = smov %s484_s7 }
  0x38   : > { %p14_p2 = scmp.ge.s32.totalorder %s17_s11, 4   ;;  %s643_s7 = smov %s488_s8 }
  0x39   : > { %s644_s8 = smov %s572_s20  ;;  %s645_s9 = smov %s496_s10 }
  0x3a   : > { %s646_s10 = smov %s648_s14  ;;  %16 = sbr.rel (!%p14_p2) target bundleno = 6 (0x6), region = 70 }
  0x3f   :  { %229 = vsyncpa [#allocation3], 1 }
  0x40   :  { %231 = vsyncpa [#allocation3 + $0x1], 1 }
  0x41   :  { %232 = vsyncpa [#allocation4], 1 }
  0x42   :  { %234 = vsyncpa [#allocation4 + $0x1], 1 }

</bundles_post_ra>
